<compile_context>
chip_gen: v7x
topology: tpu7x:2x2x1
jax: 0.10.0
libtpu: 0.0.40
codegen_flags: <defaults>
</compile_context>

<pallas_src>
import numpy as np
import jax
import jax.numpy as jnp
from jax import lax
from jax.experimental import pallas as pl
from jax.experimental.pallas import tpu as pltpu


def _round_up(x, m):
    return ((x + m - 1) // m) * m


# ---------------------------------------------------------------------------
# Pallas kernels
# ---------------------------------------------------------------------------
def _embed_kernel_gather(ids_ref, patch_ref, w_ref, table_ref, o_ref):
    """out = patches @ W + (pos_table + conv_b)[ids]   (gather done in VMEM)."""
    # patch_ref: (TM, Kp) compute dtype (streamed)
    # w_ref:     (Kp, D)  compute dtype (resident across grid steps)
    # table_ref: (NPp, D) f32 (resident; conv bias folded into every row)
    # ids_ref:   (TM, 1)  int32 (streamed)
    acc = jnp.dot(patch_ref[...], w_ref[...], preferred_element_type=jnp.float32)
    idx = ids_ref[...][:, 0]                                        # (TM,) int32
    pos = jnp.take(table_ref[...], idx, axis=0, mode="clip")        # (TM, D) f32
    o_ref[...] = (acc + pos).astype(o_ref.dtype)


def _embed_kernel_streamed(patch_ref, w_ref, pos_ref, o_ref):
    """Fallback: pos rows pre-gathered in the wrapper, streamed in compute dtype."""
    acc = jnp.dot(patch_ref[...], w_ref[...], preferred_element_type=jnp.float32)
    o_ref[...] = (acc + pos_ref[...].astype(jnp.float32)).astype(o_ref.dtype)


# ---------------------------------------------------------------------------
# One-time probe: does Mosaic lower an in-kernel row gather (jnp.take, axis=0)?
# Runs eagerly on tiny concrete shapes and validates values, so the decision is
# made once and holds even if the caller later jits the wrapper.
# ---------------------------------------------------------------------------
_IN_KERNEL_GATHER = None


def _gather_probe_kernel(ids_ref, tab_ref, o_ref):
    o_ref[...] = jnp.take(tab_ref[...], ids_ref[...][:, 0], axis=0, mode="clip")


def _in_kernel_gather_supported():
    global _IN_KERNEL_GATHER
    if _IN_KERNEL_GATHER is None:
        try:
            rows, d, m = 32, 256, 16                    # >8 rows: cross-vreg sublane gather
            tab = jnp.arange(rows, dtype=jnp.float32)[:, None] * jnp.ones((1, d), jnp.float32)
            ids = ((rows - 1) - jnp.arange(m, dtype=jnp.int32)).reshape(m, 1)
            out = pl.pallas_call(
                _gather_probe_kernel,
                out_shape=jax.ShapeDtypeStruct((m, d), jnp.float32),
            )(ids, tab)
            out = np.asarray(jax.block_until_ready(out))
            exp = np.asarray(ids, dtype=np.float32) * np.ones((1, d), np.float32)
            _IN_KERNEL_GATHER = bool(np.array_equal(out, exp))
        except Exception:
            _IN_KERNEL_GATHER = False
    return _IN_KERNEL_GATHER


# ---------------------------------------------------------------------------
# Position ids (vectorized equivalent of the torch bucketize / masked-scatter loop)
# ---------------------------------------------------------------------------
def compute_position_ids(patch_attention_mask, num_patches_per_side):
    S = num_patches_per_side
    mask = patch_attention_mask.astype(jnp.int32)                     # (B, Hp, Wp)
    _, Hp, Wp = mask.shape
    # NOTE: torch builds boundaries as arange(1/S, 1, 1/S); arange(1, S)/S is the
    # same set up to fp rounding (exact for typical S; cross-checked in the test).
    boundaries = jnp.arange(1, S, dtype=jnp.float32) / S              # (S-1,)
    nb_h = jnp.maximum(jnp.sum(mask[:, :, 0], axis=1), 1)             # guard fully-masked
    nb_w = jnp.maximum(jnp.sum(mask[:, 0, :], axis=1), 1)

    def per_image(m, nh, nw):
        # torch.arange(0, 1-1e-6, 1/nb) == {k/nb : k = 0..nb-1}; the rank-based
        # indexing below only evaluates k < nb, reproducing that exactly.
        frac_h = jnp.arange(Hp, dtype=jnp.float32) / nh
        frac_w = jnp.arange(Wp, dtype=jnp.float32) / nw
        bh = jnp.searchsorted(boundaries, frac_h, side="right")       # bucketize(right=True)
        bw = jnp.searchsorted(boundaries, frac_w, side="right")
        flat = m.reshape(-1)                                          # (Hp*Wp,)
        k = jnp.cumsum(flat) - 1                                      # rank among kept patches
        row = jnp.clip(k // nw, 0, Hp - 1)
        col = jnp.clip(k % nw, 0, Wp - 1)
        pid = bh[row] * S + bw[col]
        return jnp.where(flat > 0, pid, 0).astype(jnp.int32)

    return jax.vmap(per_image)(mask, nb_h, nb_w)                      # (B, Hp*Wp)


def _position_ids_torch_like(patch_attention_mask, num_patches_per_side):
    """Numpy emulation of the exact PyTorch per-image loop (for testing)."""
    S = num_patches_per_side
    mask = np.asarray(patch_attention_mask)
    B, Hp, Wp = mask.shape
    boundaries = np.arange(1.0 / S, 1.0, 1.0 / S, dtype=np.float32)
    out = np.zeros((B, Hp * Wp), dtype=np.int32)
    for b in range(B):
        m = mask[b]
        nh = int(m[:, 0].sum())
        nw = int(m[0, :].sum())
        fh = np.arange(0.0, 1.0 - 1e-6, 1.0 / nh, dtype=np.float32)
        fw = np.arange(0.0, 1.0 - 1e-6, 1.0 / nw, dtype=np.float32)
        bh = np.searchsorted(boundaries, fh, side="right")            # bucketize(right=True)
        bw = np.searchsorted(boundaries, fw, side="right")
        pid = (bh[:, None] * S + bw[None, :]).reshape(-1)
        flat = m.reshape(-1).astype(bool)
        out[b, flat] = pid
    return out


# ---------------------------------------------------------------------------
# Wrapper: patchify + tiled Pallas call
# ---------------------------------------------------------------------------
def idefics3_vision_embeddings(pixel_values, patch_attention_mask,
                               conv_w, conv_b, pos_table,
                               *, patch_size, num_patches_per_side,
                               tile_m=1024, compute_dtype=jnp.bfloat16):
    B, C, H, W = pixel_values.shape
    P = patch_size
    Hp, Wp = H // P, W // P
    nP = Hp * Wp
    D = conv_w.shape[0]
    K = C * P * P
    N = B * nP
    out_dtype = pixel_values.dtype
    cdt = pixel_values.dtype if compute_dtype is None else compute_dtype

    # Near-equal 8-aligned row tiles of <= tile_m rows: padding waste < 8*num_tiles
    # and the grid keeps >= 2 steps whenever N > tile_m (v7x megacore split).
    num_tiles = max(1, -(-N // tile_m))
    TM = _round_up(-(-N // num_tiles), 8)
    N_pad = num_tiles * TM
    Kp = _round_up(K, 128)                       # lane-aligned contraction dim

    # Patchify: stride==kernel "valid" Conv2d == per-patch matmul.  Cast to the
    # compute dtype (bf16 by default) BEFORE the transpose so the one materialized
    # copy is half-width; the zero-pad fuses into the same copy.
    # TODO(synk): feed the free (B, C, Hp, P, Wp, P) reshape view through the
    # BlockSpec index_map and do the (c,ph,pw) flatten in-kernel (hidden under DMA)
    # to remove this extra HBM pass entirely.
    patches = pixel_values.astype(cdt).reshape(B, C, Hp, P, Wp, P)
    patches = patches.transpose(0, 2, 4, 1, 3, 5).reshape(N, K)       # (c,ph,pw) order
    patches = jnp.pad(patches, ((0, N_pad - N), (0, Kp - K)))

    # Conv2d weight (D, C, P, P) -> (Kp, D), flattened in the same (c,ph,pw) order.
    w_mat = jnp.pad(conv_w.astype(cdt).reshape(D, K).T, ((0, Kp - K), (0, 0)))

    # Position ids. Masked-out patches keep id 0 and a real patch embedding,
    # exactly like the PyTorch module; downstream relies on the attention mask.
    pos_ids = compute_position_ids(patch_attention_mask, num_patches_per_side)
    pos_ids = jnp.pad(pos_ids.reshape(N), (0, N_pad - N)).reshape(N_pad, 1)

    # Position table with the conv bias folded into every row; kept f32 and fully
    # resident in VMEM (constant index_map) so no (N, D) pos stream is needed.
    n_pos = pos_table.shape[0]
    n_pos_pad = _round_up(n_pos, 8)
    table = pos_table.astype(jnp.float32) + conv_b.astype(jnp.float32)[None, :]
    table = jnp.pad(table, ((0, n_pos_pad - n_pos), (0, 0)))

    grid = (N_pad // TM,)
    out_shape = jax.ShapeDtypeStruct((N_pad, D), out_dtype)
    row_spec = lambda i: (i, 0)
    const_spec = lambda i: (0, 0)
    # TODO(synk): once pl.Buffered(1) is confirmed on all targets, single-buffer the
    # two resident operands (weight, pos table) to drop their second VMEM buffer.

    if _in_kernel_gather_supported():
        out = pl.pallas_call(
            _embed_kernel_gather,
            out_shape=out_shape,
            grid=grid,
            in_specs=[
                pl.BlockSpec((TM, 1), row_spec),            # streamed position ids
                pl.BlockSpec((TM, Kp), row_spec),           # streamed patch rows
                pl.BlockSpec((Kp, D), const_spec),          # resident weight
                pl.BlockSpec((n_pos_pad, D), const_spec),   # resident pos table (+bias)
            ],
            out_specs=pl.BlockSpec((TM, D), row_spec),
            compiler_params=pltpu.CompilerParams(
                dimension_semantics=("parallel",),          # megacore-shard the row axis
                allow_input_fusion=[False, True, False, False],
            ),
        )(pos_ids, patches, w_mat, table)
    else:
        # Fallback (review option 2): pre-gather the pos rows but stream them in the
        # compute dtype (not f32) and upcast inside the kernel before the add.
        pos_bias = jnp.take(table, pos_ids[:, 0], axis=0).astype(cdt)
        out = pl.pallas_call(
            _embed_kernel_streamed,
            out_shape=out_shape,
            grid=grid,
            in_specs=[
                pl.BlockSpec((TM, Kp), row_spec),
                pl.BlockSpec((Kp, D), const_spec),
                pl.BlockSpec((TM, D), row_spec),
            ],
            out_specs=pl.BlockSpec((TM, D), row_spec),
            compiler_params=pltpu.CompilerParams(
                dimension_semantics=("parallel",),
                allow_input_fusion=[True, False, False],
            ),
        )(patches, w_mat, pos_bias)

    return out[:N].reshape(B, nP, D)


# ---------------------------------------------------------------------------
# Plain-JAX reference mirroring the PyTorch forward (independent path)
# ---------------------------------------------------------------------------
def reference(pixel_values, patch_attention_mask, conv_w, conv_b, pos_table,
              *, patch_size, num_patches_per_side, compute_dtype=jnp.bfloat16):
    P = patch_size
    cdt = pixel_values.dtype if compute_dtype is None else compute_dtype
    pe = lax.conv_general_dilated(
        pixel_values.astype(cdt), conv_w.astype(cdt), (P, P), "VALID",
        dimension_numbers=("NCHW", "OIHW", "NCHW"),
        preferred_element_type=jnp.float32)
    pe = pe + conv_b.astype(jnp.float32)[None, :, None, None]
    B, D, Hp, Wp = pe.shape
    emb = pe.reshape(B, D, Hp * Wp).transpose(0, 2, 1)                # (B, nP, D)
    pos_ids = jnp.asarray(
        _position_ids_torch_like(patch_attention_mask, num_patches_per_side))
    out = emb + pos_table.astype(jnp.float32)[pos_ids]
    return out.astype(pixel_values.dtype)


if __name__ == "__main__":
    # Small config consistent with the module: image 16x16, patch 4 -> 4x4 patches.
    B, C = 2, 3
    image_size, patch_size, hidden = 16, 4, 128
    S = image_size // patch_size
    num_positions = S * S
    Hp = Wp = image_size // patch_size

    key = jax.random.PRNGKey(0)
    k1, k2, k3, k4 = jax.random.split(key, 4)
    pixel_values = jax.random.normal(k1, (B, C, image_size, image_size), jnp.float32)
    conv_w = jax.random.normal(k2, (hidden, C, patch_size, patch_size), jnp.float32) * 0.02
    conv_b = jax.random.normal(k3, (hidden,), jnp.float32) * 0.02
    pos_table = jax.random.normal(k4, (num_positions, hidden), jnp.float32) * 0.02

    # patch_attention_mask: batch 0 full image, batch 1 a smaller (3x2-patch) image.
    patch_attention_mask = jnp.zeros((B, Hp, Wp), dtype=bool)
    patch_attention_mask = patch_attention_mask.at[0].set(True)
    patch_attention_mask = patch_attention_mask.at[1, :3, :2].set(True)

    # Cross-check vectorized position ids against the exact torch-loop emulation.
    pos_vec = np.asarray(compute_position_ids(patch_attention_mask, S))
    pos_ref = _position_ids_torch_like(patch_attention_mask, S)
    assert np.array_equal(pos_vec, pos_ref), "position_ids mismatch vs torch-like loop"

    out = idefics3_vision_embeddings(
        pixel_values, patch_attention_mask, conv_w, conv_b, pos_table,
        patch_size=patch_size, num_patches_per_side=S)
    out = jax.block_until_ready(out)

    ref = reference(
        pixel_values, patch_attention_mask, conv_w, conv_b, pos_table,
        patch_size=patch_size, num_patches_per_side=S)

    assert out.shape == (B, Hp * Wp, hidden)
    assert out.dtype == pixel_values.dtype
    assert jnp.allclose(out.astype(jnp.float32), ref.astype(jnp.float32),
                        atol=2e-3, rtol=2e-2), "mismatch vs reference"
    print("KERNEL_OK")
</pallas_src>

<mosaic_0001>
module attributes {stable_mosaic.version = 11 : i64} {
  func.func @_embed_kernel_streamed(%arg0: i32, %arg1: memref<32x128xbf16, #tpu.memory_space<vmem>>, %arg2: memref<128x128xbf16, #tpu.memory_space<vmem>>, %arg3: memref<32x128xbf16, #tpu.memory_space<vmem>>, %arg4: memref<32x128xf32, #tpu.memory_space<vmem>>) attributes {dimension_semantics = [#tpu.dimension_semantics<parallel>], iteration_bounds = array<i64: 1>, scalar_prefetch = 0 : i64, scratch_operands = 0 : i64, tpu.core_type = #tpu.core_type<tc>, window_params = [{transform_indices = @transform_0, window_bounds = array<i64: 32, 128>}, {pipeline_mode = #tpu.pipeline_mode<synchronous>, transform_indices = @transform_1, window_bounds = array<i64: 128, 128>}, {transform_indices = @transform_2, window_bounds = array<i64: 32, 128>}, {transform_indices = @transform_3, window_bounds = array<i64: 32, 128>}]} {
    %c0 = arith.constant 0 : index
    %c0_0 = arith.constant 0 : index
    %0 = vector.load %arg1[%c0, %c0_0] : memref<32x128xbf16, #tpu.memory_space<vmem>>, vector<32x128xbf16>
    %c0_1 = arith.constant 0 : index
    %c0_2 = arith.constant 0 : index
    %1 = vector.load %arg2[%c0_1, %c0_2] : memref<128x128xbf16, #tpu.memory_space<vmem>>, vector<128x128xbf16>
    %cst = arith.constant dense<0.000000e+00> : vector<32x128xf32>
    %2 = tpu.matmul %0, %1, %cst {dimension_numbers = #tpu.dot_dimension_numbers<[1], [0], [0], [1], [0, 0, 1, 1], [], []>} : vector<32x128xbf16>, vector<128x128xbf16>, vector<32x128xf32> -> vector<32x128xf32>
    %c0_3 = arith.constant 0 : index
    %c0_4 = arith.constant 0 : index
    %3 = vector.load %arg3[%c0_3, %c0_4] : memref<32x128xbf16, #tpu.memory_space<vmem>>, vector<32x128xbf16>
    %4 = arith.extf %3 : vector<32x128xbf16> to vector<32x128xf32>
    %5 = arith.addf %2, %4 : vector<32x128xf32>
    %c0_5 = arith.constant 0 : index
    %c0_6 = arith.constant 0 : index
    %6 = vector.load %arg4[%c0_5, %c0_6] : memref<32x128xf32, #tpu.memory_space<vmem>>, vector<32x128xf32>
    tpu.vector_store %arg4[%c0_5, %c0_6], %5 {strides = array<i32>} : memref<32x128xf32, #tpu.memory_space<vmem>>, vector<32x128xf32>,
    return
  }
  func.func @transform_0(%arg0: i32) -> (i32, i32) {
    %c0_i32 = arith.constant 0 : i32
    %c0_i32_0 = arith.constant 0 : i32
    return %arg0, %c0_i32 : i32, i32
  }
  func.func @transform_1(%arg0: i32) -> (i32, i32) {
    %c0_i32 = arith.constant 0 : i32
    %c0_i32_0 = arith.constant 0 : i32
    %c0_i32_1 = arith.constant 0 : i32
    return %c0_i32, %c0_i32_0 : i32, i32
  }
  func.func @transform_2(%arg0: i32) -> (i32, i32) {
    %c0_i32 = arith.constant 0 : i32
    %c0_i32_0 = arith.constant 0 : i32
    return %arg0, %c0_i32 : i32, i32
  }
  func.func @transform_3(%arg0: i32) -> (i32, i32) {
    %c0_i32 = arith.constant 0 : i32
    %c0_i32_0 = arith.constant 0 : i32
    return %arg0, %c0_i32 : i32, i32
  }
}

</mosaic_0001>

<bundles_post_ra>
// kernel: tpu_custom_call.1
= control target key start
LH: loop header
LB: loop body
LE: loop exit
PB: predicated region body
PF: predicated region fallthrough
CT: control target
= control target key end

     0   :  { %8 = vsyncpa [#allocation3], 0  ;;  %s469_s0 = inlined_call_operand.hbm [shape: bf16[32,128], index: 0, kind: input, shape index: {}]   ;;  %s470_s1 = inlined_call_operand.hbm [shape: bf16[128,128], index: 1, kind: input, shape index: {}]   ;;  %s471_s2 = inlined_call_operand.hbm [shape: bf16[32,128], index: 2, kind: input, shape index: {}]   ;;  %s472_s3 = inlined_call_operand.hbm [shape: f32[32,128], index: 3, kind: output, shape index: {}]  }
   0x1   :  { %9 = vsyncpa [#allocation6], 0 }
   0x2   :  { %10 = vsyncpa [#allocation4], 0  ;;  %s377_s12 = smov [#allocation5]   ;;  %s378_s14 = smov [#allocation2]  }
   0x3   :  { %s28_s13 = sshll.u32 %s377_s12, 4  ;;  %s16_s15 = sshll.u32 %s378_s14, 4  ;;  %s29_s13 = int_to_ptr.vmem [resolvable:$true] %s28_s13  ;;  %s405_s15 = int_to_ptr.vmem [resolvable:$true] %s16_s15 }
   0x4   :  { %s283_s18 = scalar_lea.hbm %s470_s1, 1024 }
   0x5   :  { %p284_p0 = scmp.ne.s32.totalorder %s470_s1, %s283_s18  ;;  %p287_p1 = scmp.lt.u32.totalorder %s283_s18, %s470_s1 }
   0x7   :  { %p289_p2 = pnand %p287_p1, %p284_p0 }
   0x9   :  { %292 = shalt.err (!%p289_p2)
}
   0xa   :  { %s293_s23 = scalar_lea.vmem %s29_s13, 1024  ;;  %p298_p4 = scmp.lt.s32.totalorder %s29_s13, %s29_s13 }
   0xb   :  { %p294_p3 = scmp.ne.s32.totalorder %s29_s13, %s293_s23  ;;  %p299_p5 = scmp.lt.s32.totalorder %s293_s23, %s293_s23 }
   0xd   :  { %p300_p6 = por %p299_p5, %p298_p4 }
   0xf   :  { %p301_p7 = pnand %p300_p6, %p294_p3 }
  0x11   :  { %304 = shalt.err (!%p301_p7)
}
  0x12   :  { %s379_s24 = smov 64   ;;  %s380_s25 = smov 4  }
  0x13   :  { %34 = dma.hbm_to_vmem [thread:$0]  %s470_s1, 1024, %s29_s13, [#allocation6], %s379_s24, %s379_s24, %s380_s25  }
  0x14   :  { %s305_s30 = scalar_lea.hbm %s469_s0, 256 }
  0x15   :  { %p306_p8 = scmp.ne.s32.totalorder %s469_s0, %s305_s30  ;;  %p309_p9 = scmp.lt.u32.totalorder %s305_s30, %s469_s0 }
  0x17   :  { %p311_p10 = pnand %p309_p9, %p306_p8 }
  0x19   :  { %314 = shalt.err (!%p311_p10)
}
  0x1a   :  { %s315_s8 = scalar_lea.vmem %s405_s15, 256  ;;  %p320_p12 = scmp.lt.s32.totalorder %s405_s15, %s405_s15 }
  0x1b   :  { %p316_p11 = scmp.ne.s32.totalorder %s405_s15, %s315_s8  ;;  %p321_p13 = scmp.lt.s32.totalorder %s315_s8, %s315_s8 }
  0x1d   :  { %p322_p0 = por %p321_p13, %p320_p12 }
  0x1f   :  { %p323_p1 = pnand %p322_p0, %p316_p11 }
  0x21   :  { %326 = shalt.err (!%p323_p1)
}
  0x22   :  { %22 = dma.hbm_to_vmem [thread:$0]  %s469_s0, 256, %s405_s15, [#allocation3], %s379_s24, %s379_s24, %s380_s25  }
  0x23   :  { %s381_s10 = smov [#allocation7]   ;;  %s327_s14 = scalar_lea.hbm %s471_s2, 256 }
  0x24   :  { %s40_s11 = sshll.u32 %s381_s10, 4  ;;  %p328_p2 = scmp.ne.s32.totalorder %s471_s2, %s327_s14  ;;  %s41_s11 = int_to_ptr.vmem [resolvable:$true] %s40_s11 }
  0x25   :  { %p331_p3 = scmp.lt.u32.totalorder %s327_s14, %s471_s2 }
  0x27   :  { %p333_p4 = pnand %p331_p3, %p328_p2 }
  0x29   :  { %336 = shalt.err (!%p333_p4)
}
  0x2a   :  { %s337_s20 = scalar_lea.vmem %s41_s11, 256  ;;  %p342_p6 = scmp.lt.s32.totalorder %s41_s11, %s41_s11 }
  0x2b   :  { %p338_p5 = scmp.ne.s32.totalorder %s41_s11, %s337_s20  ;;  %p343_p7 = scmp.lt.s32.totalorder %s337_s20, %s337_s20 }
  0x2d   :  { %p344_p8 = por %p343_p7, %p342_p6 }
  0x2f   :  { %p345_p9 = pnand %p344_p8, %p338_p5 }
  0x31   :  { %348 = shalt.err (!%p345_p9)
}
  0x32   :  { %46 = dma.hbm_to_vmem [thread:$0]  %s471_s2, 256, %s41_s11, [#allocation6], %s379_s24, %s379_s24, %s380_s25  }
  0x33   :  { %371 = dma.done.wait [#allocation3], 256  }
  0x34   :  { %372 = vsyncadd [#allocation3], 4294967040 }
  0x35   :  { %373 = dma.done.wait [#allocation6], 1280  }
  0x36   :  { %374 = vsyncadd [#allocation6], 4294966016  ;;  %v273_v0 = vld [vmem:[#allocation5] sm:$0xff]   ;;  %v274_v1 = vld [vmem:[#allocation5 + $0x8] sm:$0xff]   ;;  %s382_s2 = smov [#allocation8]  }
  0x37   :  { %245 = vmatprep.subr.bf16.mxu0 %v273_v0  ;;  %v275_v2 = vld [vmem:[#allocation5 + $0x10] sm:$0xff]   ;;  %v276_v3 = vld [vmem:[#allocation5 + $0x18] sm:$0xff]   ;;  %v277_v5 = vld [vmem:[#allocation5 + $0x20] sm:$0xff]   ;;  %s203_s21 = sshll.u32 %s382_s2, 4  ;;  %s204_s21 = int_to_ptr.vmem [resolvable:$true] %s203_s21 }
  0x38   :  { %246 = vmatpush3.bf16.msra.mxu0 %v273_v0  ;;  %v281_v4 = vld [vmem:[#allocation2] sm:$0xff]   ;;  %v278_v6 = vld [vmem:[#allocation5 + $0x28] sm:$0xff]   ;;  %v280_v8 = vld [vmem:[#allocation5 + $0x38] sm:$0xff]   ;;  %s349_s22 = scalar_lea.vmem %s204_s21, 512  ;;  %p354_p11 = scmp.lt.s32.totalorder %s204_s21, %s204_s21 }
  0x39   :  { %247 = vmatprep.subr.bf16.mxu0 %v274_v1  ;;  %261 = vmatprep.mubr.bf16.mxu0 %v281_v4  ;;  %v279_v7 = vld [vmem:[#allocation5 + $0x30] sm:$0xff]   ;;  %v282_v9 = vld [vmem:[#allocation2 + $0x8] sm:$0xff]   ;;  %v234_v10 = vld [vmem:[#allocation7 + $0x8] sm:$0xff]   ;;  %p350_p10 = scmp.ne.s32.totalorder %s204_s21, %s349_s22  ;;  %p355_p12 = scmp.lt.s32.totalorder %s349_s22, %s349_s22 }
  0x3a   :  { %v227_v11 = vld [vmem:[#allocation7] sm:$0xff]   ;;  %v232_v12 = vunpack.c.l.bf16 %v234_v10  ;;  %v233_v14 = vunpack.c.h.bf16 %v234_v10 }
  0x3b   :  { %v228_v13 = vunpack.c.l.bf16 %v227_v11  ;;  %v229_v16 = vunpack.c.h.bf16 %v227_v11  ;;  %p356_p13 = por %p355_p12, %p354_p11 }
  0x3c   :  { %248 = vmatpush3.bf16.msra.mxu0 %v274_v1 }
  0x3d   :  { %249 = vmatprep.subr.bf16.mxu0 %v275_v2  ;;  %p357_p0 = pnand %p356_p13, %p350_p10 }
  0x40   :  { %250 = vmatpush3.bf16.msra.mxu0 %v275_v2 }
  0x41   :  { %251 = vmatprep.subr.bf16.mxu0 %v276_v3 }
  0x44   :  { %252 = vmatpush3.bf16.msra.mxu0 %v276_v3 }
  0x45   :  { %253 = vmatprep.subr.bf16.mxu0 %v277_v5 }
  0x48   :  { %254 = vmatpush3.bf16.msra.mxu0 %v277_v5 }
  0x49   :  { %255 = vmatprep.subr.bf16.mxu0 %v278_v6 }
  0x4c   :  { %256 = vmatpush3.bf16.msra.mxu0 %v278_v6 }
  0x4d   :  { %257 = vmatprep.subr.bf16.mxu0 %v279_v7 }
  0x50   :  { %258 = vmatpush3.bf16.msra.mxu0 %v279_v7 }
  0x51   :  { %259 = vmatprep.subr.bf16.mxu0 %v280_v8 }
  0x54   :  { %260 = vmatpush3.bf16.msra.mxu0 %v280_v8 }
  0x57   :  { %262 = vmatmul.mubr.bf16.vlgmr.msra.gmra.mrb[0].mxu0 %v282_v9 }
 0x12a   :  { %v263_v15 = vpop.f32.mrb[0].mxu0 }
 0x12b   :  { %v188_v17 = vadd.f32 %v263_v15, %v232_v12  ;;  %v179_v18 = vpop.f32.mrb[1].mxu0 }
 0x12c   :  { %v180_v19 = vadd.f32 %v228_v13, %v179_v18  ;;  %v264_v20 = vpop.f32.mrb[2].mxu0 }
 0x12d   :  { %196 = vst [vmem:[#allocation8 + $0x10] sm:$0xff] %v188_v17  ;;  %v191_v21 = vadd.f32 %v264_v20, %v233_v14  ;;  %v182_v22 = vpop.f32.mrb[3].mxu0 }
 0x12e   :  { %194 = vst [vmem:[#allocation8] sm:$0xff] %v180_v19  ;;  %v183_v23 = vadd.f32 %v229_v16, %v182_v22 }
 0x12f   :  { %197 = vst [vmem:[#allocation8 + $0x18] sm:$0xff] %v191_v21 }
 0x130   :  { %195 = vst [vmem:[#allocation8 + $0x8] sm:$0xff] %v183_v23 }
 0x131   :  { %360 = shalt.err (!%p357_p0)
}
 0x132   :  { %s361_s25 = scalar_lea.hbm %s472_s3, 512 }
 0x133   :  { %p362_p1 = scmp.ne.s32.totalorder %s472_s3, %s361_s25  ;;  %p365_p2 = scmp.lt.u32.totalorder %s361_s25, %s472_s3 }
 0x135   :  { %p367_p3 = pnand %p365_p2, %p362_p1 }
 0x137   :  { %370 = shalt.err (!%p367_p3)
}
 0x138   :  { %s383_s30 = smov 128   ;;  %s384_s4 = smov 8  }
 0x139   :  { %209 = dma.vmem_to_hbm [thread:$0]  %s204_s21, 512, %s472_s3, [#allocation4], %s383_s30, %s383_s30, %s384_s4  }
 0x13a   :  { %375 = dma.done.wait [#allocation4], 512  }
 0x13b   :  { %376 = vsyncadd [#allocation4], 4294966784 }
 0x13c   :  { %213 = vsyncpa [#allocation3], 1 }
 0x13d   :  { %214 = vsyncpa [#allocation6], 1 }
 0x13e   :  { %215 = vsyncpa [#allocation4], 1 }

</bundles_post_ra>
